<compile_context>
chip_gen: v5e
topology: v5e:2x2
jax: 0.10.0
libtpu: 0.0.40
codegen_flags: <defaults>
</compile_context>

<pallas_src>
import functools

import jax
import jax.numpy as jnp
from jax.experimental import pallas as pl
from jax.experimental.pallas import tpu as pltpu


def _focal_loss_kernel(logits_ref, targets_ref, out_ref, acc_ref, *,
                       gamma, true_b, tile_b, tiles_per_slice, needs_mask):
    s = pl.program_id(0)          # parallel slice index
    j = pl.program_id(1)          # tile index within the slice (reduction axis)

    @pl.when(j == 0)
    def _():
        acc_ref[...] = jnp.zeros_like(acc_ref)

    x = logits_ref[...].astype(jnp.float32)            # [TB, C] (upcast bf16 -> f32)
    t = targets_ref[...]                               # [TB, 1] int32
    tb, c = x.shape

    # log-softmax pieces along the class (lane) axis; (x - m) is consumed only by exp.
    m = jnp.max(x, axis=-1, keepdims=True)             # [TB, 1]
    e = jnp.exp(x - m)                                 # [TB, C]
    lse = jnp.log(jnp.sum(e, axis=-1, keepdims=True))  # [TB, 1]

    # Gather the target logit from x via a masked reduction (no full logp materialization).
    cls_idx = jax.lax.broadcasted_iota(jnp.int32, (tb, c), 1)
    x_t = jnp.sum(jnp.where(cls_idx == t, x, 0.0), axis=-1, keepdims=True)  # [TB, 1]
    logp_t = (x_t - m) - lse                            # [TB, 1]

    ce = -logp_t                                        # per-sample cross-entropy
    pt = jnp.exp(logp_t)                                # prob of the target class
    one_minus_pt = 1.0 - pt

    g = gamma
    if isinstance(g, (int, float)) and float(g) == int(g):
        gi = int(g)
        if gi == 0:
            w = jnp.ones_like(one_minus_pt)
        elif gi == 1:
            w = one_minus_pt
        elif gi == 2:
            w = one_minus_pt * one_minus_pt             # avoid pow -> exp+log on the EUP
        else:
            w = jax.lax.integer_pow(one_minus_pt, gi)
    else:
        w = one_minus_pt ** g
    focal = w * ce                                      # [TB, 1]

    if needs_mask:
        # Mask rows past the true batch (padded tail tile and/or clamped duplicate tiles).
        gtile = s * tiles_per_slice + j                 # global (unclamped) tile index
        row_idx = jax.lax.broadcasted_iota(jnp.int32, (tb, 1), 0) + gtile * tile_b
        focal = jnp.where(row_idx < true_b, focal, 0.0)

    acc_ref[...] += focal                               # [TB, 1] vector accumulator

    @pl.when(j == pl.num_programs(1) - 1)
    def _():
        partial = jnp.sum(acc_ref[...])                 # one reduce per slice
        out_ref[...] = jnp.full((1, 8, 128), partial, dtype=jnp.float32)


def _sublane(itemsize):
    """Native sublane packing for the dtype: 8 rows f32, 16 bf16, 32 int8."""
    return max(8, 32 // max(1, itemsize))


def _choose_tile_b(B, C, itemsize):
    """Pick a batch-tile size: ~8 MiB per logits tile (hides per-step overhead on all
    generations), rows clamped to [sublane, 4096], aligned to the dtype's sublane pack."""
    sub = _sublane(itemsize)
    c_pad = max(128, ((C + 127) // 128) * 128)
    bytes_per_row = c_pad * itemsize
    tb = (8 * 1024 * 1024) // bytes_per_row
    tb = max(sub, min(4096, tb))
    tb = max(sub, (tb // sub) * sub)
    if B <= tb:
        return B                                        # single full block (any B allowed)
    return tb


def _vmem_limit_bytes(tb, C, itemsize):
    """Explicit scoped-VMEM limit: double-buffered logits + targets + scratch + slack,
    clamped to [32 MiB, 48 MiB] (v5e default is only 16 MiB; v7x physical is 64 MiB)."""
    c_pad = max(128, ((C + 127) // 128) * 128)
    logits_tile = tb * c_pad * itemsize
    targets_tile = tb * 128 * 4                         # (tb,1) int32, lane-padded
    acc = tb * 128 * 4                                  # (tb,1) f32 scratch, lane-padded
    est = 2 * logits_tile + 2 * targets_tile + acc + 2 * (8 * 128 * 4) + (1 << 20)
    return int(min(48 * 1024 * 1024, max(32 * 1024 * 1024, est)))


def focal_loss(inputs, targets, weight=None, gamma=2, reduction="mean",
               tile_b=None, num_slices=None):
    """Pallas TPU focal loss.

    inputs:  [B, C] float logits (f32 or bf16; kept in HBM dtype, upcast in-kernel)
    targets: [B] int class indices, or [B, C] one-hot
    """
    if weight is not None:
        raise NotImplementedError("class `weight` is not supported")  # TODO(synk)
    if reduction not in ("mean", "sum"):
        raise NotImplementedError("reduction='none' is not supported")  # TODO(synk)

    # Mirror the PyTorch branch converting one-hot targets to indices.
    if targets.ndim > 1 and targets.shape[1] > 1:
        targets = jnp.argmax(targets, axis=1)
    targets = targets.astype(jnp.int32).reshape(-1, 1)  # [B, 1]

    B, C = inputs.shape
    itemsize = inputs.dtype.itemsize
    sub = _sublane(itemsize)

    tb = tile_b if tile_b is not None else _choose_tile_b(B, C, itemsize)
    if B <= tb:
        tb = B                                          # single full block
    else:
        tb = max(sub, (tb // sub) * sub)                # dtype-aware sublane alignment
    n_tiles = pl.cdiv(B, tb)

    # Parallel slices (v7x has 2 TensorCores; harmless single-core on v5e/v6e).
    if num_slices is None:
        num_slices = 2 if n_tiles >= 2 else 1
    num_slices = max(1, min(num_slices, n_tiles))
    tiles_per_slice = pl.cdiv(n_tiles, num_slices)

    needs_clamp = num_slices * tiles_per_slice > n_tiles
    needs_mask = num_slices * tiles_per_slice * tb != B

    if needs_clamp:
        def tile_index(s, j):
            return jnp.minimum(s * tiles_per_slice + j, n_tiles - 1)
    else:
        def tile_index(s, j):
            return s * tiles_per_slice + j

    kernel = functools.partial(
        _focal_loss_kernel,
        gamma=gamma, true_b=B, tile_b=tb,
        tiles_per_slice=tiles_per_slice, needs_mask=needs_mask,
    )

    out = pl.pallas_call(
        kernel,
        out_shape=jax.ShapeDtypeStruct((num_slices, 8, 128), jnp.float32),
        grid_spec=pltpu.PrefetchScalarGridSpec(
            num_scalar_prefetch=0,
            grid=(num_slices, tiles_per_slice),
            in_specs=[
                pl.BlockSpec((tb, C), lambda s, j: (tile_index(s, j), 0)),  # logits tile
                pl.BlockSpec((tb, 1), lambda s, j: (tile_index(s, j), 0)),  # targets tile
            ],
            out_specs=pl.BlockSpec((1, 8, 128), lambda s, j: (s, 0, 0)),    # per-slice partial
            scratch_shapes=[pltpu.VMEM((tb, 1), jnp.float32)],              # running focal sum
        ),
        compiler_params=pltpu.CompilerParams(
            dimension_semantics=("parallel", "arbitrary"),
            vmem_limit_bytes=_vmem_limit_bytes(tb, C, itemsize),
        ),
    )(inputs, targets)

    total = out[:, 0, 0].sum()
    if reduction == "mean":
        total = total * (1.0 / B)
    return total


def _reference_focal_loss(inputs, targets, gamma=2, reduction="mean"):
    if targets.ndim > 1 and targets.shape[1] > 1:
        targets = jnp.argmax(targets, axis=1)
    logp = jax.nn.log_softmax(inputs.astype(jnp.float32), axis=1)
    logp_t = jnp.take_along_axis(logp, targets[:, None].astype(jnp.int32), axis=1)[:, 0]
    ce = -logp_t
    pt = jnp.exp(logp_t)
    fl = (1.0 - pt) ** gamma * ce
    return fl.mean() if reduction == "mean" else fl.sum()


if __name__ == "__main__":
    key = jax.random.PRNGKey(0)
    k1, k2 = jax.random.split(key)
    B, C = 20, 32
    logits = jax.random.normal(k1, (B, C), dtype=jnp.float32)
    targets = jax.random.randint(k2, (B,), 0, C, dtype=jnp.int32)

    ref_mean = _reference_focal_loss(logits, targets)
    ref_sum = _reference_focal_loss(logits, targets, reduction="sum")

    # Tiled path: 3 tiles of 8 rows, 2 parallel slices -> exercises clamp + tail mask.
    out = jax.block_until_ready(focal_loss(logits, targets, tile_b=8))
    assert jnp.allclose(out, ref_mean, atol=1e-5, rtol=1e-5), (out, ref_mean)

    out_sum = jax.block_until_ready(focal_loss(logits, targets, reduction="sum", tile_b=8))
    assert jnp.allclose(out_sum, ref_sum, atol=1e-5, rtol=1e-5), (out_sum, ref_sum)

    # Default tile selection (single full block here -> single slice).
    out_full = jax.block_until_ready(focal_loss(logits, targets))
    assert jnp.allclose(out_full, ref_mean, atol=1e-5, rtol=1e-5), (out_full, ref_mean)

    # Evenly-divisible tiling (no masking / no clamping compile-time branch).
    B2 = 48
    logits2 = jax.random.normal(k1, (B2, C), dtype=jnp.float32)
    targets2 = jax.random.randint(k2, (B2,), 0, C, dtype=jnp.int32)
    ref2 = _reference_focal_loss(logits2, targets2)
    out2 = jax.block_until_ready(focal_loss(logits2, targets2, tile_b=8))
    assert jnp.allclose(out2, ref2, atol=1e-5, rtol=1e-5), (out2, ref2)

    # One-hot targets branch.
    onehot_targets = jax.nn.one_hot(targets, C, dtype=jnp.float32)
    out_oh = jax.block_until_ready(focal_loss(logits, onehot_targets, tile_b=8))
    assert jnp.allclose(out_oh, ref_mean, atol=1e-5, rtol=1e-5), (out_oh, ref_mean)

    # bf16 logits (kept bf16 in HBM, upcast in-kernel); 16-row tiles honor bf16 sublane pack.
    logits_bf16 = logits.astype(jnp.bfloat16)
    out_bf16 = jax.block_until_ready(focal_loss(logits_bf16, targets, tile_b=16))
    ref_bf16 = _reference_focal_loss(logits_bf16.astype(jnp.float32), targets)
    assert jnp.allclose(out_bf16, ref_bf16, atol=2e-2, rtol=2e-2), (out_bf16, ref_bf16)

    print("KERNEL_OK")
</pallas_src>

<mosaic_0001>
module attributes {stable_mosaic.version = 11 : i64} {
  func.func @_focal_loss_kernel(%arg0: i32, %arg1: i32, %arg2: memref<8x32xf32, #tpu.memory_space<vmem>>, %arg3: memref<8x1xi32, #tpu.memory_space<vmem>>, %arg4: memref<1x8x128xf32, #tpu.memory_space<vmem>>, %arg5: memref<8x1xf32, #tpu.memory_space<vmem>>) attributes {dimension_semantics = [#tpu.dimension_semantics<parallel>, #tpu.dimension_semantics<arbitrary>], iteration_bounds = array<i64: 2, 2>, scalar_prefetch = 0 : i64, scratch_operands = 1 : i64, tpu.core_type = #tpu.core_type<tc>, window_params = [{transform_indices = @transform_0, window_bounds = array<i64: 8, 32>}, {transform_indices = @transform_1, window_bounds = array<i64: 8, 1>}, {transform_indices = @transform_2, window_bounds = array<i64: 1, 8, 128>}]} {
    %c0_i32 = arith.constant 0 : i32
    %0 = arith.cmpi eq, %arg1, %c0_i32 : i32
    %1 = arith.extui %0 : i1 to i32
    %c0_i32_0 = arith.constant 0 : i32
    %2 = arith.cmpi ne, %1, %c0_i32_0 : i32
    scf.if %2 {
      %cst_15 = arith.constant 0.000000e+00 : f32
      %45 = vector.broadcast %cst_15 : f32 to vector<8x1xf32>
      %c0_16 = arith.constant 0 : index
      %c0_17 = arith.constant 0 : index
      %46 = vector.load %arg5[%c0_16, %c0_17] : memref<8x1xf32, #tpu.memory_space<vmem>>, vector<8x1xf32>
      tpu.vector_store %arg5[%c0_16, %c0_17], %45 {strides = array<i32>} : memref<8x1xf32, #tpu.memory_space<vmem>>, vector<8x1xf32>,
    } else {
    }
    %c0 = arith.constant 0 : index
    %c0_1 = arith.constant 0 : index
    %3 = vector.load %arg2[%c0, %c0_1] : memref<8x32xf32, #tpu.memory_space<vmem>>, vector<8x32xf32>
    %c0_2 = arith.constant 0 : index
    %c0_3 = arith.constant 0 : index
    %4 = vector.load %arg3[%c0_2, %c0_3] : memref<8x1xi32, #tpu.memory_space<vmem>>, vector<8x1xi32>
    %cst = arith.constant dense<0xFF800000> : vector<8xf32>
    %5 = vector.multi_reduction <maximumf>, %3, %cst [1] : vector<8x32xf32> to vector<8xf32>
    %6 = vector.shape_cast %5 : vector<8xf32> to vector<8x1xf32>
    %7 = vector.broadcast %6 : vector<8x1xf32> to vector<8x32xf32>
    %8 = arith.subf %3, %7 : vector<8x32xf32>
    %9 = math.exp %8 : vector<8x32xf32>
    %cst_4 = arith.constant dense<0.000000e+00> : vector<8xf32>
    %10 = vector.multi_reduction <add>, %9, %cst_4 [1] : vector<8x32xf32> to vector<8xf32>
    %11 = vector.shape_cast %10 : vector<8xf32> to vector<8x1xf32>
    %12 = math.log %11 : vector<8x1xf32>
    %13 = tpu.iota {dimensions = array<i32: 1>} : vector<8x32xi32>
    %14 = vector.broadcast %4 : vector<8x1xi32> to vector<8x32xi32>
    %15 = arith.cmpi eq, %13, %14 : vector<8x32xi32>
    %cst_5 = arith.constant 0.000000e+00 : f32
    %16 = vector.broadcast %cst_5 : f32 to vector<8x32xf32>
    %17 = arith.select %15, %3, %16 : vector<8x32xi1>, vector<8x32xf32>
    %cst_6 = arith.constant dense<0.000000e+00> : vector<8xf32>
    %18 = vector.multi_reduction <add>, %17, %cst_6 [1] : vector<8x32xf32> to vector<8xf32>
    %19 = vector.shape_cast %18 : vector<8xf32> to vector<8x1xf32>
    %20 = arith.subf %19, %6 : vector<8x1xf32>
    %21 = arith.subf %20, %12 : vector<8x1xf32>
    %cst_7 = arith.constant 0.000000e+00 : f32
    %22 = vector.broadcast %cst_7 : f32 to vector<8x1xf32>
    %23 = arith.subf %22, %21 : vector<8x1xf32>
    %24 = math.exp %21 : vector<8x1xf32>
    %cst_8 = arith.constant 1.000000e+00 : f32
    %25 = vector.broadcast %cst_8 : f32 to vector<8x1xf32>
    %26 = arith.subf %25, %24 : vector<8x1xf32>
    %27 = arith.mulf %26, %26 : vector<8x1xf32>
    %28 = arith.mulf %27, %23 : vector<8x1xf32>
    %c2_i32 = arith.constant 2 : i32
    %29 = arith.muli %arg0, %c2_i32 : i32
    %30 = arith.addi %29, %arg1 : i32
    %31 = tpu.iota {dimensions = array<i32: 0>} : vector<8x1xi32>
    %c8_i32 = arith.constant 8 : i32
    %32 = arith.muli %30, %c8_i32 : i32
    %33 = vector.broadcast %32 : i32 to vector<8x1xi32>
    %34 = arith.addi %31, %33 : vector<8x1xi32>
    %c20_i32 = arith.constant 20 : i32
    %35 = vector.broadcast %c20_i32 : i32 to vector<8x1xi32>
    %36 = arith.cmpi slt, %34, %35 : vector<8x1xi32>
    %cst_9 = arith.constant 0.000000e+00 : f32
    %37 = vector.broadcast %cst_9 : f32 to vector<8x1xf32>
    %38 = arith.select %36, %28, %37 : vector<8x1xi1>, vector<8x1xf32>
    %c0_10 = arith.constant 0 : index
    %c0_11 = arith.constant 0 : index
    %39 = vector.load %arg5[%c0_10, %c0_11] : memref<8x1xf32, #tpu.memory_space<vmem>>, vector<8x1xf32>
    %40 = arith.addf %39, %38 : vector<8x1xf32>
    %c0_12 = arith.constant 0 : index
    %c0_13 = arith.constant 0 : index
    %41 = vector.load %arg5[%c0_12, %c0_13] : memref<8x1xf32, #tpu.memory_space<vmem>>, vector<8x1xf32>
    tpu.vector_store %arg5[%c0_12, %c0_13], %40 {strides = array<i32>} : memref<8x1xf32, #tpu.memory_space<vmem>>, vector<8x1xf32>,
    %c1_i32 = arith.constant 1 : i32
    %42 = arith.cmpi eq, %arg1, %c1_i32 : i32
    %43 = arith.extui %42 : i1 to i32
    %c0_i32_14 = arith.constant 0 : i32
    %44 = arith.cmpi ne, %43, %c0_i32_14 : i32
    scf.if %44 {
      %c0_15 = arith.constant 0 : index
      %c0_16 = arith.constant 0 : index
      %45 = vector.load %arg5[%c0_15, %c0_16] : memref<8x1xf32, #tpu.memory_space<vmem>>, vector<8x1xf32>
      %46 = vector.shape_cast %45 : vector<8x1xf32> to vector<1x8x1xf32>
      %cst_17 = arith.constant dense<0.000000e+00> : vector<1xf32>
      %47 = vector.multi_reduction <add>, %46, %cst_17 [1, 2] : vector<1x8x1xf32> to vector<1xf32>
      %48 = vector.shape_cast %47 : vector<1xf32> to vector<1x1x1xf32>
      %49 = vector.extract %48[0, 0, 0] : f32 from vector<1x1x1xf32>
      %50 = vector.broadcast %49 : f32 to vector<1x8x128xf32>
      %c0_18 = arith.constant 0 : index
      %c0_19 = arith.constant 0 : index
      %c0_20 = arith.constant 0 : index
      %51 = vector.load %arg4[%c0_18, %c0_19, %c0_20] : memref<1x8x128xf32, #tpu.memory_space<vmem>>, vector<1x8x128xf32>
      tpu.vector_store %arg4[%c0_18, %c0_19, %c0_20], %50 {strides = array<i32>} : memref<1x8x128xf32, #tpu.memory_space<vmem>>, vector<1x8x128xf32>,
    } else {
    }
    return
  }
  func.func @transform_0(%arg0: i32, %arg1: i32) -> (i32, i32) {
    %c2_i32 = arith.constant 2 : i32
    %0 = arith.muli %arg0, %c2_i32 : i32
    %1 = arith.addi %0, %arg1 : i32
    %c2_i32_0 = arith.constant 2 : i32
    %2 = arith.minsi %1, %c2_i32_0 : i32
    %c0_i32 = arith.constant 0 : i32
    %c0_i32_1 = arith.constant 0 : i32
    return %2, %c0_i32 : i32, i32
  }
  func.func @transform_1(%arg0: i32, %arg1: i32) -> (i32, i32) {
    %c2_i32 = arith.constant 2 : i32
    %0 = arith.muli %arg0, %c2_i32 : i32
    %1 = arith.addi %0, %arg1 : i32
    %c2_i32_0 = arith.constant 2 : i32
    %2 = arith.minsi %1, %c2_i32_0 : i32
    %c0_i32 = arith.constant 0 : i32
    %c0_i32_1 = arith.constant 0 : i32
    return %2, %c0_i32 : i32, i32
  }
  func.func @transform_2(%arg0: i32, %arg1: i32) -> (i32, i32, i32) {
    %c0_i32 = arith.constant 0 : i32
    %c0_i32_0 = arith.constant 0 : i32
    %c0_i32_1 = arith.constant 0 : i32
    return %arg0, %c0_i32, %c0_i32_0 : i32, i32, i32
  }
}

</mosaic_0001>

<bundles_post_ra>
// kernel: tpu_custom_call.1
= control target key start
LH: loop header
LB: loop body
LE: loop exit
PB: predicated region body
PF: predicated region fallthrough
CT: control target
= control target key end

     0   :  { %7 = vsyncpa [#allocation4], 0  ;;  %s754_s0 = inlined_call_operand.vmem [shape: f32[20,32], index: 0, kind: input, shape index: {}]   ;;  %s755_s1 = inlined_call_operand.vmem [shape: s32[20,1], index: 1, kind: input, shape index: {}]   ;;  %s756_s2 = inlined_call_operand.hbm [shape: f32[2,8,128], index: 2, kind: output, shape index: {}]  }
   0x1   :  { %9 = vsyncpa [#allocation4 + $0x1], 0  ;;  %s613_s9 = smov 0   ;;  %s615_s10 = smov 0  }
   0x2   :  { %s617_s11 = smov 0   ;;  %s619_s12 = smov 0  }
   0x3   :  { %s621_s13 = smov 0   ;;  %s623_s14 = smov 0  }
   0x4   :  { %s625_s15 = smov 0   ;;  %s627_s16 = smov 0  }
   0x5 LB: > { %s390_s17 = sadd.s32 4294967295, %s594_s16   ;;  %s391_s18 = sadd.s32 4294967294, %s594_s16   ;;  %s594_s16 = sphi %s627_s16, %s15_s16   ;;  %s590_s15 = sphi %s625_s15, %s765_s15   ;;  %s586_s14 = sphi %s623_s14, %s764_s14   ;;  %s582_s13 = sphi %s621_s13, %s763_s13   ;;  %s578_s12 = sphi %s619_s12, %s762_s12   ;;  %s574_s11 = sphi %s617_s11, %s761_s11   ;;  %s570_s10 = sphi %s615_s10, %s760_s10   ;;  %s566_s9 = sphi %s613_s9, %s759_s9  }
   0x6   : > { %s24_s19 = sadd.s32 1, %s586_s14  ;;  %s27_s20 = sadd.s32 1, %s590_s15 }
   0x7   : > { %p25_p0 = scmp.ge.s32.totalorder %s24_s19, 2  ;;  %p112_p1 = scmp.ne.s32.totalorder %s574_s11, %s570_s10 }
   0x8   : > { %p113_p2 = scmp.eq.s32.totalorder %s390_s17, 3  ;;  %p118_p4 = scmp.ne.s32.totalorder %s570_s10, %s566_s9 }
   0x9   : > { %s767_s19 = smov (%p25_p0, %s24_s19), 0  ;;  %s769_s20 = smov (!%p25_p0, %s27_s20), %s590_s15 }
   0xa   : > { %p662_p3 = por %p113_p2, %p112_p1  ;;  %p29_p5 = scmp.ge.s32.totalorder %s769_s20, 2 }
   0xb   : > { %p119_p6 = scmp.eq.s32.totalorder %s391_s18, 3  ;;  %p398_p7 = scmp.ge.s32.totalorder %s594_s16, 1 }
   0xc   : > { %p167_p8 = scmp.lt.s32.totalorder %s594_s16, 5  ;;  %s771_s20 = smov (%p29_p5, %s769_s20), 0 }
   0xd   : > { %p672_p9 = por %p119_p6, %p118_p4  ;;  %s99_s23 = ssub.s32 %s590_s15, %s771_s20 }
   0xe   : > { %p168_p10 = pnand %p398_p7, %p167_p8  ;;  %s102_s24 = sadd.s32 1, %s574_s11 }
   0xf   : > { %p100_p11 = scmp.eq.s32.totalorder %s99_s23, 0  ;;  %s197_s26 = sand.u32 (!%p168_p10), 1, %s570_s10  }
  0x10   : > { %171 = sbr.rel (%p168_p10) target bundleno = 511 (0x1ff), region = 28  ;;  %s400_s27 = sshll.u32 (!%p168_p10), %s582_s13, 1 }
  0x11   : > { %s680_s25 = scalar_select %p100_p11, %s574_s11, %s102_s24  }
  0x12   : > { %s686_s28 = sshll.u32 (!%p168_p10), %s197_s26, 3  ;;  %s689_s29 = sadd.s32 (!%p168_p10), %s578_s12, %s400_s27 }
  0x13   : > { %p202_p12 = scmp.lt.s32.totalorder (!%p168_p10), %s689_s29, 2  ;;  %s199_s18 = scalar_lea.vmem (!%p168_p10), [#allocation3], %s686_s28 }
  0x14   : > { %p410_p13 = scmp.ne.s32.totalorder (!%p168_p10), %s578_s12, 0 }
  0x15   : > { %s203_s30 = scalar_select %p202_p12, %s689_s29, 2 }
  0x16   : > { %227 = sbr.rel (%p410_p13) target bundleno = 29 (0x1d), region = 32 }
  0x17   : > { %s773_s30 = smov (!%p202_p12, %s203_s30), 2 }
  0x18   : > { %s404_s3 = sshll.u32 %s773_s30, 3 }
  0x19   : > { %s207_s6 = scalar_lea.vmem %s754_s0, %s404_s3  ;;  %s219_s17 = scalar_lea.vmem %s755_s1, %s404_s3 }
  0x1b   : > { %vm228_vm0 = vcmask 7168   ;;  %v596_v0 = vmov 0.0  }
  0x1c   : > { %229 = vst.msk [vmem:[#allocation2] sm:$0xff] %vm228_vm0, %v596_v0 }
  0x1d PF: > { %v230_v1 = vld [vmem:[%s207_s6] sm:$0xff]  ;;  %vm232_vm1 = vcmask 261120   ;;  %v597_v3 = vmov 0   ;;  %v244_v10 = vlaneseq  ;;  %s412_s23 = sshll.u32 %s689_s29, 3  ;;  %vm273_vm4 = vcmask 7168   ;;  %p413_p0 = scmp.ne.s32.totalorder %s578_s12, 1 }
  0x1e   : > { %v233_v2 = vsel %vm232_vm1, %v230_v1, -inf  ;;  %493 = vset.pattern.permute.xlu0 %v597_v3  ;;  %v231_v4 = vld [vmem:[%s219_s17] sm:$0xff]  ;;  %v267_v23 = vstv %s412_s23 }
  0x1f   : > { %234 = vmax.xlane.f32.xlu0 %v233_v2  ;;  %v245_v11 = vand.u32 127, %v244_v10  ;;  %v265_v22 = vshrl.u32 %v244_v10, 7 }
  0x21   : > { %v268_v25 = vadd.s32 %v267_v23, %v265_v22 }
  0x23   : > { %vm269_vm3 = vcmp.lt.s32.totalorder %v268_v25, 20  ;;  %v271_v29 = vld [vmem:[#allocation2] sm:$0xff] }
  0x33   : > { %247 = vperm.xlu0 %493, %v231_v4  }
  0x92   : > { %v235_v5 = vpop.xlane.xlu0 %234 }
  0x93   : > { %v236_v6 = vsub.f32 %v230_v1, %v235_v5 }
  0x95   : > { %v237_v7 = vmul.f32 1.442695, %v236_v6 }
  0x97   : > { %494 = vpow2.f32 %v237_v7 }
  0x9d   : > { %v495_v8 = vpop.eup %494 }
  0x9e   : > { %v239_v9 = vsel %vm232_vm1, %v495_v8, 0.0 }
  0x9f   : > { %240 = vadd.xlane.f32.xlu1 %v239_v9 }
  0xa5   : > { %v248_v12 = vpop.permute.xlu0 %247 }
  0xa6   : > { %vm249_vm2 = vcmp.eq.s32.totalorder %v245_v11, %v248_v12 }
  0xa7   : > { %v250_v13 = vsel %vm249_vm2, %v230_v1, 0.0 }
  0xa8   : > { %v251_v14 = vsel %vm232_vm1, %v250_v13, 0.0 }
  0xa9   : > { %252 = vadd.xlane.f32.xlu1 %v251_v14 }
 0x112   : > { %v241_v15 = vpop.xlane.xlu1 %240 }
 0x113   : > { %496 = vlog2.f32 %v241_v15 }
 0x119   : > { %v497_v16 = vpop.eup %496 }
 0x11a   : > { %v243_v18 = vmul.f32 0.6931472, %v497_v16 }
 0x11c   : > { %v253_v17 = vpop.xlane.xlu1 %252 }
 0x11d   : > { %v254_v19 = vsub.f32 %v253_v17, %v235_v5 }
 0x11f   : > { %v255_v20 = vsub.f32 %v254_v19, %v243_v18 }
 0x121   : > { %v257_v21 = vmul.f32 1.442695, %v255_v20  ;;  %v256_v27 = vsub.f32 0.0, %v255_v20 }
 0x123   : > { %498 = vpow2.f32 %v257_v21 }
 0x129   : > { %v499_v24 = vpop.eup %498 }
 0x12a   : > { %v259_v26 = vsub.f32 1.0, %v499_v24 }
 0x12c   : > { %v260_v28 = vmul.f32 %v259_v26, %v259_v26 }
 0x12e   : > { %v261_v30 = vmul.f32 %v260_v28, %v256_v27 }
 0x12f   : > { %278 = sbr.rel (%p413_p0) target bundleno = 496 (0x1f0), region = 36 }
 0x130   : > { %v270_v31 = vsel %vm269_vm3, %v261_v30, 0.0 }
 0x131   : > { %v272_v32 = vadd.f32 %v271_v29, %v270_v31 }
 0x133   : > { %274 = vst.msk [vmem:[#allocation2] sm:$0xff] %vm273_vm4, %v272_v32 }
 0x13a   : > { %v279_v33 = vld [vmem:[#allocation2] sm:$0xff] }
 0x13b   : > { %v280_v34 = vsel %vm273_vm4, %v279_v33, 0.0 }
 0x13c   : > { %281 = vadd.xlane.f32.xlu0 %v280_v34 }
 0x1af   : > { %v282_v35 = vpop.xlane.xlu0 %281 }
 0x1b0   : > { %v283_v36 = vrot.slane %v282_v35, 4 }
 0x1b2   : > { %v284_v37 = vadd.f32 %v283_v36, %v282_v35 }
 0x1b4   : > { %v285_v38 = vrot.slane %v284_v37, 2 }
 0x1b6   : > { %v286_v39 = vadd.f32 %v285_v38, %v284_v37 }
 0x1b8   : > { %v287_v40 = vrot.slane %v286_v39, 1 }
 0x1ba   : > { %v288_v41 = vadd.f32 %v287_v40, %v286_v39 }
 0x1bc   : > { %418 = vpush %v288_v41 }
 0x1ed   : > { %s419_s24 = spop %418 }
 0x1ee   : > { %v290_v42 = vstv %s419_s24 }
 0x1ef   : > { %291 = vst [vmem:[%s199_s18] sm:$0xff] %v290_v42 }
 0x1f0 PF: > { %s415_s12 = sshll.u32 %s582_s13, 3  ;;  %s305_s3 = sshll.u32 %s199_s18, 4  ;;  %s306_s3 = int_to_ptr.vmem [resolvable:$true] %s305_s3 }
 0x1f1   : > { %s303_s30 = scalar_lea.hbm %s756_s2, %s415_s12  ;;  %s293_s5 = scalar_lea.sflag [#allocation4], %s197_s26 }
 0x1f2   : > { %s307_s4 = sshll.u32 %s303_s30, 4  ;;  %s520_s17 = scalar_lea.hbm %s756_s2, 16  ;;  %s308_s4 = int_to_ptr.hbm [resolvable:$true] %s307_s4 }
 0x1f3   : > { %s514_s6 = sshra.s32 %s308_s4, 4  ;;  %s515_s6 = int_to_ptr.hbm [resolvable:$true] %s514_s6 }
 0x1f4   : > { %s516_s7 = scalar_lea.hbm %s515_s6, 8  ;;  %p521_p5 = scmp.lt.s32.totalorder %s515_s6, %s756_s2 }
 0x1f5   : > { %p517_p1 = scmp.ne.s32.totalorder %s515_s6, %s516_s7  ;;  %p522_p6 = scmp.lt.s32.totalorder %s520_s17, %s516_s7 }
 0x1f7   : > { %p518_p2 = pnand %p517_p1, %p662_p3  ;;  %p523_p7 = por %p522_p6, %p521_p5 }
 0x1f9   : > { %p519_p4 = pneg %p518_p2 }
 0x1fb   : > { %p524_p8 = pnand %p523_p7, %p519_p4 }
 0x1fd   : > { %527 = shalt.err (!%p524_p8)
}
 0x1fe   : > { %420 = dma.vmem_to_hbm [thread:$0]  (%p662_p3), %s306_s3, 128, %s308_s4, %s293_s5  }
 0x1ff PF: > { %p426_p10 = scmp.ge.s32.totalorder %s594_s16, 2  ;;  %s319_s26 = sand.u32 1, %s566_s9  }
 0x200   : > { %s320_s28 = scalar_lea.sflag [#allocation4], %s319_s26 }
 0x201   : > { %p423_p11 = pnand %p426_p10, %p672_p9 }
 0x203   : > { %p424_p12 = pneg %p423_p11 }
 0x205   : > { %561 = dma.done.wait (%p424_p12), %s320_s28, 128  }
 0x206   : > { %563 = vsyncadd (%p424_p12), %s320_s28, 4294967168  ;;  %s15_s16 = sadd.s32 1, %s594_s16   ;;  %s759_s9 = smov %s570_s10 }
 0x207   : > { %p12_p13 = scmp.ge.s32.totalorder %s15_s16, 6   ;;  %s760_s10 = smov %s574_s11 }
 0x208   : > { %s761_s11 = smov %s680_s25  ;;  %s762_s12 = smov %s586_s14 }
 0x209   : > { %s763_s13 = smov %s590_s15  ;;  %s764_s14 = smov %s767_s19 }
 0x20a   : > { %s765_s15 = smov %s771_s20  ;;  %14 = sbr.rel (!%p12_p13) target bundleno = 5 (0x5), region = 74 }
 0x20f   :  { %326 = vsyncpa [#allocation4], 1 }
 0x210   :  { %328 = vsyncpa [#allocation4 + $0x1], 1 }

</bundles_post_ra>
